<compile_context>
chip_gen: v5e
topology: v5e:2x2
jax: 0.10.0
libtpu: 0.0.40
codegen_flags: <defaults>
</compile_context>

<pallas_src>
import functools

import jax
import jax.numpy as jnp
from jax.experimental import pallas as pl
from jax.experimental.pallas import tpu as pltpu

_LANES = 128
_SUBLANES = 8


def _round_up(n, m):
    return ((n + m - 1) // m) * m


def _mlp_kernel(x_ref,
                w1_ref, b1_ref,
                w2_ref, b2_ref,
                w3_ref, b3_ref,
                w4_ref, b4_ref,
                o_ref):
    """One batch tile of the fused MLP forward, entirely in VMEM."""
    cdt = w1_ref.dtype  # compute dtype for MXU operands (f32 or bf16)
    x = x_ref[...].astype(cdt)
    # Matmuls accumulate in f32; biases/tanh/sigmoid stay f32.
    h = jnp.tanh(
        jnp.dot(x, w1_ref[...], preferred_element_type=jnp.float32) + b1_ref[...])
    h = jnp.tanh(
        jnp.dot(h.astype(cdt), w2_ref[...],
                preferred_element_type=jnp.float32) + b2_ref[...])
    h = jnp.tanh(
        jnp.dot(h.astype(cdt), w3_ref[...],
                preferred_element_type=jnp.float32) + b3_ref[...])
    z = jnp.dot(h.astype(cdt), w4_ref[...],
                preferred_element_type=jnp.float32) + b4_ref[...]
    o_ref[...] = jax.nn.sigmoid(z).astype(o_ref.dtype)


def _pad2(a, rows, cols):
    return jnp.pad(a, ((0, rows - a.shape[0]), (0, cols - a.shape[1])))


def _pad_params(params, compute_dtype):
    """Zero-pad hidden widths up to lane multiples; keep the final width exact.

    Exact: zero weight rows/cols and zero bias entries keep padded lanes at 0
    through tanh (tanh(0)=0). The last layer keeps its true (narrow) output
    width so the kernel writes an unpadded [B, n_out] result.
    """
    n_in = params["w1"].shape[0]
    outs = [params[f"w{i}"].shape[1] for i in range(1, 5)]
    # Pad hidden layer outputs (1..3) to 128-lane multiples; keep layer 4 exact.
    outs_pad = [_round_up(d, _LANES) for d in outs[:3]] + [outs[3]]
    ins_pad = [n_in] + outs_pad[:3]
    pp = {}
    for i in range(4):
        w = _pad2(params[f"w{i + 1}"], ins_pad[i], outs_pad[i])
        pp[f"w{i + 1}"] = w.astype(compute_dtype)
        pp[f"b{i + 1}"] = _pad2(params[f"b{i + 1}"], 1, outs_pad[i])  # f32
    return pp


def _choose_tile(batch, tile_b):
    """Batch tile: multiple of 8 sublanes, >=2 grid steps whenever possible."""
    if batch <= _SUBLANES:
        return batch  # single tile; block == full dim (exempt from 8-div rule)
    if batch >= 2 * tile_b:
        return tile_b
    # Split the batch into (at least) two tiles so both v7x TCs get work.
    return _round_up(pl.cdiv(batch, 2), _SUBLANES)


def net_forward(x, params, *, tile_b=4096, compute_dtype=jnp.float32):
    """Run the fused MLP Pallas kernel.

    x: [B, n_input] float32
    params: dict with w1..w4 (shape [in, out]) and b1..b4 (shape [1, out]).
    compute_dtype: dtype fed to the MXU (f32 exact, bf16 fast on v6e/v7x).
    """
    B, n_in = x.shape
    n_out = params["w4"].shape[1]

    pp = _pad_params(params, compute_dtype)

    tb = _choose_tile(B, tile_b)
    grid = (pl.cdiv(B, tb),)  # ragged tail block is masked by Pallas

    def resident(a):
        # Constant block index across the batch grid -> fetched once, VMEM-resident.
        return pl.BlockSpec(a.shape, lambda i: (0, 0))

    out = pl.pallas_call(
        _mlp_kernel,
        out_shape=jax.ShapeDtypeStruct((B, n_out), jnp.float32),
        grid=grid,
        in_specs=[pl.BlockSpec((tb, n_in), lambda i: (i, 0)),
                  resident(pp["w1"]), resident(pp["b1"]),
                  resident(pp["w2"]), resident(pp["b2"]),
                  resident(pp["w3"]), resident(pp["b3"]),
                  resident(pp["w4"]), resident(pp["b4"])],
        out_specs=pl.BlockSpec((tb, n_out), lambda i: (i, 0)),
        compiler_params=pltpu.CompilerParams(
            dimension_semantics=("parallel",)),
    )(x,
      pp["w1"], pp["b1"],
      pp["w2"], pp["b2"],
      pp["w3"], pp["b3"],
      pp["w4"], pp["b4"])
    return out


def init_params(key, n_input, n_output):
    """Deterministic parameter init (PyTorch-style uniform(-1/sqrt(fan_in), +))."""
    dims = [n_input, 150, 90, 60, n_output]
    params = {}
    for i in range(4):
        fan_in, fan_out = dims[i], dims[i + 1]
        key, kw, kb = jax.random.split(key, 3)
        bound = 1.0 / jnp.sqrt(fan_in)
        params[f"w{i + 1}"] = jax.random.uniform(
            kw, (fan_in, fan_out), jnp.float32, -bound, bound)
        params[f"b{i + 1}"] = jax.random.uniform(
            kb, (1, fan_out), jnp.float32, -bound, bound)
    return params


def net_forward_ref(x, params):
    """Pure-JAX reference for correctness checking."""
    h = jnp.tanh(x @ params["w1"] + params["b1"])
    h = jnp.tanh(h @ params["w2"] + params["b2"])
    h = jnp.tanh(h @ params["w3"] + params["b3"])
    return jax.nn.sigmoid(h @ params["w4"] + params["b4"])


if __name__ == "__main__":
    n_input, n_output = 32, 4
    batch = 8

    key = jax.random.PRNGKey(0)
    key, kx = jax.random.split(key)
    x = jax.random.normal(kx, (batch, n_input), dtype=jnp.float32)
    params = init_params(key, n_input, n_output)

    # Exact f32 path, default (large) tile: small batch -> single tile.
    fwd = jax.jit(net_forward)
    out = jax.block_until_ready(fwd(x, params))
    ref = net_forward_ref(x, params)
    assert out.shape == (batch, n_output)
    assert jnp.allclose(out, ref, atol=1e-5, rtol=1e-5)

    # Ragged multi-tile path: B=300 not a tile multiple (no pad/slice in wrapper).
    key, kx2 = jax.random.split(key)
    x2 = jax.random.normal(kx2, (300, n_input), dtype=jnp.float32)
    out2 = jax.block_until_ready(fwd(x2, params))           # tb=152, grid=(2,)
    ref2 = net_forward_ref(x2, params)
    assert out2.shape == (300, n_output)
    assert jnp.allclose(out2, ref2, atol=1e-5, rtol=1e-5)

    # Forced small tile -> 3 grid steps with a masked tail block (300 -> 3x128).
    fwd_small = jax.jit(functools.partial(net_forward, tile_b=128))
    out3 = jax.block_until_ready(fwd_small(x2, params))
    assert out3.shape == (300, n_output)
    assert jnp.allclose(out3, ref2, atol=1e-5, rtol=1e-5)

    # bf16 MXU path (v6e/v7x fast path); looser tolerance as expected.
    fwd_bf16 = jax.jit(functools.partial(net_forward, compute_dtype=jnp.bfloat16))
    out4 = jax.block_until_ready(fwd_bf16(x2, params))
    assert out4.shape == (300, n_output)
    assert jnp.allclose(out4, ref2, atol=5e-2, rtol=0.0)

    print("KERNEL_OK")
</pallas_src>

<mosaic_0001>
module attributes {stable_mosaic.version = 11 : i64} {
  func.func @_mlp_kernel(%arg0: i32, %arg1: memref<8x32xf32, #tpu.memory_space<vmem>>, %arg2: memref<32x256xf32, #tpu.memory_space<vmem>>, %arg3: memref<1x256xf32, #tpu.memory_space<vmem>>, %arg4: memref<256x128xf32, #tpu.memory_space<vmem>>, %arg5: memref<1x128xf32, #tpu.memory_space<vmem>>, %arg6: memref<128x128xf32, #tpu.memory_space<vmem>>, %arg7: memref<1x128xf32, #tpu.memory_space<vmem>>, %arg8: memref<128x4xf32, #tpu.memory_space<vmem>>, %arg9: memref<1x4xf32, #tpu.memory_space<vmem>>, %arg10: memref<8x4xf32, #tpu.memory_space<vmem>>) attributes {dimension_semantics = [#tpu.dimension_semantics<parallel>], iteration_bounds = array<i64: 1>, scalar_prefetch = 0 : i64, scratch_operands = 0 : i64, tpu.core_type = #tpu.core_type<tc>, window_params = [{transform_indices = @transform_0, window_bounds = array<i64: 8, 32>}, {pipeline_mode = #tpu.pipeline_mode<synchronous>, transform_indices = @transform_1, window_bounds = array<i64: 32, 256>}, {pipeline_mode = #tpu.pipeline_mode<synchronous>, transform_indices = @transform_2, window_bounds = array<i64: 1, 256>}, {pipeline_mode = #tpu.pipeline_mode<synchronous>, transform_indices = @transform_3, window_bounds = array<i64: 256, 128>}, {pipeline_mode = #tpu.pipeline_mode<synchronous>, transform_indices = @transform_4, window_bounds = array<i64: 1, 128>}, {pipeline_mode = #tpu.pipeline_mode<synchronous>, transform_indices = @transform_5, window_bounds = array<i64: 128, 128>}, {pipeline_mode = #tpu.pipeline_mode<synchronous>, transform_indices = @transform_6, window_bounds = array<i64: 1, 128>}, {pipeline_mode = #tpu.pipeline_mode<synchronous>, transform_indices = @transform_7, window_bounds = array<i64: 128, 4>}, {pipeline_mode = #tpu.pipeline_mode<synchronous>, transform_indices = @transform_8, window_bounds = array<i64: 1, 4>}, {transform_indices = @transform_9, window_bounds = array<i64: 8, 4>}]} {
    %c0 = arith.constant 0 : index
    %c0_0 = arith.constant 0 : index
    %0 = vector.load %arg1[%c0, %c0_0] : memref<8x32xf32, #tpu.memory_space<vmem>>, vector<8x32xf32>
    %c0_1 = arith.constant 0 : index
    %c0_2 = arith.constant 0 : index
    %1 = vector.load %arg2[%c0_1, %c0_2] : memref<32x256xf32, #tpu.memory_space<vmem>>, vector<32x256xf32>
    %cst = arith.constant dense<0.000000e+00> : vector<8x256xf32>
    %2 = tpu.matmul %0, %1, %cst {dimension_numbers = #tpu.dot_dimension_numbers<[1], [0], [0], [1], [0, 0, 1, 1], [], []>} : vector<8x32xf32>, vector<32x256xf32>, vector<8x256xf32> -> vector<8x256xf32>
    %c0_3 = arith.constant 0 : index
    %c0_4 = arith.constant 0 : index
    %3 = vector.load %arg3[%c0_3, %c0_4] : memref<1x256xf32, #tpu.memory_space<vmem>>, vector<1x256xf32>
    %4 = vector.broadcast %3 : vector<1x256xf32> to vector<8x256xf32>
    %5 = arith.addf %2, %4 : vector<8x256xf32>
    %6 = math.tanh %5 : vector<8x256xf32>
    %c0_5 = arith.constant 0 : index
    %c0_6 = arith.constant 0 : index
    %7 = vector.load %arg4[%c0_5, %c0_6] : memref<256x128xf32, #tpu.memory_space<vmem>>, vector<256x128xf32>
    %cst_7 = arith.constant dense<0.000000e+00> : vector<8x128xf32>
    %8 = tpu.matmul %6, %7, %cst_7 {dimension_numbers = #tpu.dot_dimension_numbers<[1], [0], [0], [1], [0, 0, 1, 1], [], []>} : vector<8x256xf32>, vector<256x128xf32>, vector<8x128xf32> -> vector<8x128xf32>
    %c0_8 = arith.constant 0 : index
    %c0_9 = arith.constant 0 : index
    %9 = vector.load %arg5[%c0_8, %c0_9] : memref<1x128xf32, #tpu.memory_space<vmem>>, vector<1x128xf32>
    %10 = vector.broadcast %9 : vector<1x128xf32> to vector<8x128xf32>
    %11 = arith.addf %8, %10 : vector<8x128xf32>
    %12 = math.tanh %11 : vector<8x128xf32>
    %c0_10 = arith.constant 0 : index
    %c0_11 = arith.constant 0 : index
    %13 = vector.load %arg6[%c0_10, %c0_11] : memref<128x128xf32, #tpu.memory_space<vmem>>, vector<128x128xf32>
    %cst_12 = arith.constant dense<0.000000e+00> : vector<8x128xf32>
    %14 = tpu.matmul %12, %13, %cst_12 {dimension_numbers = #tpu.dot_dimension_numbers<[1], [0], [0], [1], [0, 0, 1, 1], [], []>} : vector<8x128xf32>, vector<128x128xf32>, vector<8x128xf32> -> vector<8x128xf32>
    %c0_13 = arith.constant 0 : index
    %c0_14 = arith.constant 0 : index
    %15 = vector.load %arg7[%c0_13, %c0_14] : memref<1x128xf32, #tpu.memory_space<vmem>>, vector<1x128xf32>
    %16 = vector.broadcast %15 : vector<1x128xf32> to vector<8x128xf32>
    %17 = arith.addf %14, %16 : vector<8x128xf32>
    %18 = math.tanh %17 : vector<8x128xf32>
    %c0_15 = arith.constant 0 : index
    %c0_16 = arith.constant 0 : index
    %19 = vector.load %arg8[%c0_15, %c0_16] : memref<128x4xf32, #tpu.memory_space<vmem>>, vector<128x4xf32>
    %cst_17 = arith.constant dense<0.000000e+00> : vector<8x4xf32>
    %20 = tpu.matmul %18, %19, %cst_17 {dimension_numbers = #tpu.dot_dimension_numbers<[1], [0], [0], [1], [0, 0, 1, 1], [], []>} : vector<8x128xf32>, vector<128x4xf32>, vector<8x4xf32> -> vector<8x4xf32>
    %c0_18 = arith.constant 0 : index
    %c0_19 = arith.constant 0 : index
    %21 = vector.load %arg9[%c0_18, %c0_19] : memref<1x4xf32, #tpu.memory_space<vmem>>, vector<1x4xf32>
    %22 = vector.broadcast %21 : vector<1x4xf32> to vector<8x4xf32>
    %23 = arith.addf %20, %22 : vector<8x4xf32>
    %24 = arith.negf %23 : vector<8x4xf32>
    %25 = math.exp %24 : vector<8x4xf32>
    %cst_20 = arith.constant 1.000000e+00 : f32
    %26 = vector.broadcast %cst_20 : f32 to vector<8x4xf32>
    %27 = arith.addf %26, %25 : vector<8x4xf32>
    %28 = arith.divf %26, %27 : vector<8x4xf32>
    %c0_21 = arith.constant 0 : index
    %c0_22 = arith.constant 0 : index
    %29 = vector.load %arg10[%c0_21, %c0_22] : memref<8x4xf32, #tpu.memory_space<vmem>>, vector<8x4xf32>
    tpu.vector_store %arg10[%c0_21, %c0_22], %28 {strides = array<i32>} : memref<8x4xf32, #tpu.memory_space<vmem>>, vector<8x4xf32>,
    return
  }
  func.func @transform_0(%arg0: i32) -> (i32, i32) {
    %c0_i32 = arith.constant 0 : i32
    %c0_i32_0 = arith.constant 0 : i32
    return %arg0, %c0_i32 : i32, i32
  }
  func.func @transform_1(%arg0: i32) -> (i32, i32) {
    %c0_i32 = arith.constant 0 : i32
    %c0_i32_0 = arith.constant 0 : i32
    %c0_i32_1 = arith.constant 0 : i32
    return %c0_i32, %c0_i32_0 : i32, i32
  }
  func.func @transform_2(%arg0: i32) -> (i32, i32) {
    %c0_i32 = arith.constant 0 : i32
    %c0_i32_0 = arith.constant 0 : i32
    %c0_i32_1 = arith.constant 0 : i32
    return %c0_i32, %c0_i32_0 : i32, i32
  }
  func.func @transform_3(%arg0: i32) -> (i32, i32) {
    %c0_i32 = arith.constant 0 : i32
    %c0_i32_0 = arith.constant 0 : i32
    %c0_i32_1 = arith.constant 0 : i32
    return %c0_i32, %c0_i32_0 : i32, i32
  }
  func.func @transform_4(%arg0: i32) -> (i32, i32) {
    %c0_i32 = arith.constant 0 : i32
    %c0_i32_0 = arith.constant 0 : i32
    %c0_i32_1 = arith.constant 0 : i32
    return %c0_i32, %c0_i32_0 : i32, i32
  }
  func.func @transform_5(%arg0: i32) -> (i32, i32) {
    %c0_i32 = arith.constant 0 : i32
    %c0_i32_0 = arith.constant 0 : i32
    %c0_i32_1 = arith.constant 0 : i32
    return %c0_i32, %c0_i32_0 : i32, i32
  }
  func.func @transform_6(%arg0: i32) -> (i32, i32) {
    %c0_i32 = arith.constant 0 : i32
    %c0_i32_0 = arith.constant 0 : i32
    %c0_i32_1 = arith.constant 0 : i32
    return %c0_i32, %c0_i32_0 : i32, i32
  }
  func.func @transform_7(%arg0: i32) -> (i32, i32) {
    %c0_i32 = arith.constant 0 : i32
    %c0_i32_0 = arith.constant 0 : i32
    %c0_i32_1 = arith.constant 0 : i32
    return %c0_i32, %c0_i32_0 : i32, i32
  }
  func.func @transform_8(%arg0: i32) -> (i32, i32) {
    %c0_i32 = arith.constant 0 : i32
    %c0_i32_0 = arith.constant 0 : i32
    %c0_i32_1 = arith.constant 0 : i32
    return %c0_i32, %c0_i32_0 : i32, i32
  }
  func.func @transform_9(%arg0: i32) -> (i32, i32) {
    %c0_i32 = arith.constant 0 : i32
    %c0_i32_0 = arith.constant 0 : i32
    return %arg0, %c0_i32 : i32, i32
  }
}

</mosaic_0001>

<bundles_post_ra>
// kernel: net_forward.1
= control target key start
LH: loop header
LB: loop body
LE: loop exit
PB: predicated region body
PF: predicated region fallthrough
CT: control target
= control target key end

     0   :  { %vm47_vm0 = vcmask 261120   ;;  %vm270_vm4 = vcmask 31744   ;;  %s578_s1 = inlined_call_operand.vmem [shape: f32[32,256], index: 1, kind: input, shape index: {}]   ;;  %s579_s3 = inlined_call_operand.vmem [shape: f32[256,128], index: 3, kind: input, shape index: {}]   ;;  %s580_s0 = inlined_call_operand.vmem [shape: f32[8,32], index: 0, kind: input, shape index: {}]   ;;  %s581_s4 = inlined_call_operand.vmem [shape: f32[1,128], index: 4, kind: input, shape index: {}]   ;;  %s582_s5 = inlined_call_operand.vmem [shape: f32[128,128], index: 5, kind: input, shape index: {}]   ;;  %s583_s2 = inlined_call_operand.vmem [shape: f32[1,256], index: 2, kind: input, shape index: {}]   ;;  %s584_s6 = inlined_call_operand.vmem [shape: f32[1,128], index: 6, kind: input, shape index: {}]   ;;  %s585_s7 = inlined_call_operand.vmem [shape: f32[128,4], index: 7, kind: input, shape index: {}]   ;;  %s586_s8 = inlined_call_operand.vmem [shape: f32[1,4], index: 8, kind: input, shape index: {}]   ;;  %s587_s9 = inlined_call_operand.vmem [shape: f32[8,4], index: 9, kind: output, shape index: {}]  }
   0x1   :  { %v39_v0 = vld [vmem:[%s578_s1 + $0x30] sm:$0xff]  ;;  %v37_v1 = vld [vmem:[%s578_s1 + $0x20] sm:$0xff]  ;;  %v40_v2 = vld [vmem:[%s578_s1 + $0x38] sm:$0xff] }
   0x2   :  { %63 = vmatpush.msra.mxu0 %v39_v0  ;;  %83 = vmatpush.msra.mxu1 %v40_v2  ;;  %v38_v3 = vld [vmem:[%s578_s1 + $0x28] sm:$0xff]  ;;  %v35_v4 = vld [vmem:[%s578_s1 + $0x10] sm:$0xff]  ;;  %v36_v5 = vld [vmem:[%s578_s1 + $0x18] sm:$0xff] }
   0x3   :  { %v108_v6 = vld [vmem:[%s579_s3 + $0x78] sm:$0xff]  ;;  %v107_v7 = vld [vmem:[%s579_s3 + $0x70] sm:$0xff]  ;;  %v33_v9 = vld [vmem:[%s578_s1] sm:$0xff] }
   0x4   :  { %64 = vmatpush.msra.mxu0 %v37_v1  ;;  %84 = vmatpush.msra.mxu1 %v38_v3  ;;  %v124_v8 = vld [vmem:[%s579_s3 + $0xf8] sm:$0xff]  ;;  %v34_v10 = vld [vmem:[%s578_s1 + $0x8] sm:$0xff]  ;;  %v123_v11 = vld [vmem:[%s579_s3 + $0xf0] sm:$0xff] }
   0x5   :  { %129 = vmatpush.msra.mxu2 %v108_v6  ;;  %149 = vmatpush.msra.mxu3 %v124_v8  ;;  %v32_v12 = vld [vmem:[%s580_s0] sm:$0xff]  ;;  %v106_v13 = vld [vmem:[%s579_s3 + $0x68] sm:$0xff]  ;;  %v104_v17 = vld [vmem:[%s579_s3 + $0x58] sm:$0xff] }
   0x6   :  { %65 = vmatpush.msra.mxu0 %v35_v4  ;;  %85 = vmatpush.msra.mxu1 %v36_v5  ;;  %v122_v14 = vld [vmem:[%s579_s3 + $0xe8] sm:$0xff]  ;;  %v105_v15 = vld [vmem:[%s579_s3 + $0x60] sm:$0xff]  ;;  %v120_v18 = vld [vmem:[%s579_s3 + $0xd8] sm:$0xff] }
   0x7   :  { %130 = vmatpush.msra.mxu2 %v107_v7  ;;  %150 = vmatpush.msra.mxu3 %v123_v11  ;;  %v121_v16 = vld [vmem:[%s579_s3 + $0xe0] sm:$0xff]  ;;  %v103_v19 = vld [vmem:[%s579_s3 + $0x50] sm:$0xff]  ;;  %v102_v21 = vld [vmem:[%s579_s3 + $0x48] sm:$0xff] }
   0x8   :  { %66 = vmatpush.msra.mxu0 %v33_v9  ;;  %86 = vmatpush.msra.mxu1 %v34_v10  ;;  %v119_v20 = vld [vmem:[%s579_s3 + $0xd0] sm:$0xff]  ;;  %v118_v22 = vld [vmem:[%s579_s3 + $0xc8] sm:$0xff]  ;;  %v101_v23 = vld [vmem:[%s579_s3 + $0x40] sm:$0xff] }
   0x9   :  { %276 = vmatmul.msk.f32.vlgmr.msra.gmra.mxu0 %vm47_vm0, %v32_v12  ;;  %277 = vmatmul.msk.f32.vlgmr.msra.gmra.mxu1 %vm47_vm0, %v32_v12  ;;  %v117_v24 = vld [vmem:[%s579_s3 + $0xc0] sm:$0xff]  ;;  %v100_v25 = vld [vmem:[%s579_s3 + $0x38] sm:$0xff]  ;;  %v99_v27 = vld [vmem:[%s579_s3 + $0x30] sm:$0xff] }
   0xa   :  { %131 = vmatpush.msra.mxu2 %v106_v13  ;;  %151 = vmatpush.msra.mxu3 %v122_v14  ;;  %v116_v26 = vld [vmem:[%s579_s3 + $0xb8] sm:$0xff]  ;;  %v115_v28 = vld [vmem:[%s579_s3 + $0xb0] sm:$0xff]  ;;  %v98_v29 = vld [vmem:[%s579_s3 + $0x28] sm:$0xff] }
   0xb   :  { %v97_v30 = vld [vmem:[%s579_s3 + $0x20] sm:$0xff]  ;;  %v114_v31 = vld [vmem:[%s579_s3 + $0xa8] sm:$0xff]  ;;  %v96_v32 = vld [vmem:[%s579_s3 + $0x18] sm:$0xff] }
   0xc   :  { %132 = vmatpush.msra.mxu2 %v105_v15  ;;  %152 = vmatpush.msra.mxu3 %v121_v16  ;;  %v113_v33 = vld [vmem:[%s579_s3 + $0xa0] sm:$0xff]  ;;  %v95_v34 = vld [vmem:[%s579_s3 + $0x10] sm:$0xff]  ;;  %v112_v35 = vld [vmem:[%s579_s3 + $0x98] sm:$0xff] }
   0xd   :  { %v94_v36 = vld [vmem:[%s579_s3 + $0x8] sm:$0xff]  ;;  %v111_v37 = vld [vmem:[%s579_s3 + $0x90] sm:$0xff]  ;;  %v93_v38 = vld [vmem:[%s579_s3] sm:$0xff] }
   0xe   :  { %133 = vmatpush.msra.mxu2 %v104_v17  ;;  %153 = vmatpush.msra.mxu3 %v120_v18  ;;  %v110_v39 = vld [vmem:[%s579_s3 + $0x88] sm:$0xff]  ;;  %v109_v40 = vld [vmem:[%s579_s3 + $0x80] sm:$0xff]  ;;  %v185_v41 = vld [vmem:[%s582_s5 + $0x78] sm:$0xff] }
   0xf   :  { %v184_v42 = vld [vmem:[%s582_s5 + $0x70] sm:$0xff]  ;;  %190 = vmatpush.msrb.mxu0 %v185_v41  ;;  %v183_v43 = vld [vmem:[%s582_s5 + $0x68] sm:$0xff]  ;;  %v182_v44 = vld [vmem:[%s582_s5 + $0x60] sm:$0xff] }
  0x10   :  { %134 = vmatpush.msra.mxu2 %v103_v19  ;;  %154 = vmatpush.msra.mxu3 %v119_v20  ;;  %v181_v45 = vld [vmem:[%s582_s5 + $0x58] sm:$0xff]  ;;  %v180_v46 = vld [vmem:[%s582_s5 + $0x50] sm:$0xff]  ;;  %v179_v47 = vld [vmem:[%s582_s5 + $0x48] sm:$0xff] }
  0x11   :  { %191 = vmatpush.msrb.mxu0 %v184_v42  ;;  %v178_v48 = vld [vmem:[%s582_s5 + $0x40] sm:$0xff]  ;;  %v177_v49 = vld [vmem:[%s582_s5 + $0x38] sm:$0xff]  ;;  %v176_v51 = vld [vmem:[%s582_s5 + $0x30] sm:$0xff] }
  0x12   :  { %135 = vmatpush.msra.mxu2 %v102_v21  ;;  %155 = vmatpush.msra.mxu3 %v118_v22  ;;  %v41_v50 = vld [vmem:[%s583_s2] sm:$0x3]  ;;  %v175_v60 = vld [vmem:[%s582_s5 + $0x28] sm:$0xff]  ;;  %v173_v62 = vld [vmem:[%s582_s5 + $0x18] sm:$0xff] }
  0x13   :  { %192 = vmatpush.msrb.mxu0 %v183_v43  ;;  %v43_v52 = vperm.slane %v41_v50, 0  ;;  %v44_v53 = vperm.slane %v41_v50, 1  ;;  %v174_v61 = vld [vmem:[%s582_s5 + $0x20] sm:$0xff]  ;;  %v172_v63 = vld [vmem:[%s582_s5 + $0x10] sm:$0xff]  ;;  %v171_v0 = vld [vmem:[%s582_s5 + $0x8] sm:$0xff] }
  0x14   :  { %136 = vmatpush.msra.mxu2 %v101_v23  ;;  %156 = vmatpush.msra.mxu3 %v117_v24  ;;  %v170_v1 = vld [vmem:[%s582_s5] sm:$0xff]  ;;  %v226_v2 = vld [vmem:[%s585_s7 + $0x78] sm:$0xff]  ;;  %v225_v3 = vld [vmem:[%s585_s7 + $0x70] sm:$0xff] }
  0x15   :  { %193 = vmatpush.msrb.mxu0 %v182_v44  ;;  %231 = vmatpush.msrb.mxu1 %v226_v2  ;;  %v224_v4 = vld [vmem:[%s585_s7 + $0x68] sm:$0xff]  ;;  %v223_v5 = vld [vmem:[%s585_s7 + $0x60] sm:$0xff]  ;;  %v222_v6 = vld [vmem:[%s585_s7 + $0x58] sm:$0xff] }
  0x16   :  { %137 = vmatpush.msra.mxu2 %v100_v25  ;;  %157 = vmatpush.msra.mxu3 %v116_v26  ;;  %v221_v7 = vld [vmem:[%s585_s7 + $0x50] sm:$0xff]  ;;  %v220_v8 = vld [vmem:[%s585_s7 + $0x48] sm:$0xff]  ;;  %v219_v9 = vld [vmem:[%s585_s7 + $0x40] sm:$0xff] }
  0x17   :  { %194 = vmatpush.msrb.mxu0 %v181_v45  ;;  %232 = vmatpush.msrb.mxu1 %v225_v3  ;;  %v218_v10 = vld [vmem:[%s585_s7 + $0x38] sm:$0xff]  ;;  %v217_v11 = vld [vmem:[%s585_s7 + $0x30] sm:$0xff]  ;;  %v279_v12 = vld [vmem:[%s581_s4] ss:$0 sm:$0xff] }
  0x18   :  { %138 = vmatpush.msra.mxu2 %v99_v27  ;;  %158 = vmatpush.msra.mxu3 %v115_v28  ;;  %v216_v13 = vld [vmem:[%s585_s7 + $0x28] sm:$0xff]  ;;  %v215_v19 = vld [vmem:[%s585_s7 + $0x20] sm:$0xff]  ;;  %v214_v20 = vld [vmem:[%s585_s7 + $0x18] sm:$0xff] }
  0x19   :  { %195 = vmatpush.msrb.mxu0 %v180_v46  ;;  %233 = vmatpush.msrb.mxu1 %v224_v4  ;;  %v213_v21 = vld [vmem:[%s585_s7 + $0x10] sm:$0xff]  ;;  %v212_v22 = vld [vmem:[%s585_s7 + $0x8] sm:$0xff]  ;;  %v211_v23 = vld [vmem:[%s585_s7] sm:$0xff] }
  0x1a   :  { %139 = vmatpush.msra.mxu2 %v98_v29  ;;  %159 = vmatpush.msra.mxu3 %v114_v31  ;;  %v280_v24 = vld [vmem:[%s584_s6] ss:$0 sm:$0xff] }
  0x1b   :  { %196 = vmatpush.msrb.mxu0 %v179_v47  ;;  %234 = vmatpush.msrb.mxu1 %v223_v5  ;;  %v281_v28 = vld [vmem:[%s586_s8] ss:$0 sm:$0xff] }
  0x1c   :  { %140 = vmatpush.msra.mxu2 %v97_v30  ;;  %160 = vmatpush.msra.mxu3 %v113_v33 }
  0x1d   :  { %197 = vmatpush.msrb.mxu0 %v178_v48  ;;  %235 = vmatpush.msrb.mxu1 %v222_v6 }
  0x1e   :  { %141 = vmatpush.msra.mxu2 %v96_v32  ;;  %161 = vmatpush.msra.mxu3 %v112_v35 }
  0x1f   :  { %198 = vmatpush.msrb.mxu0 %v177_v49  ;;  %236 = vmatpush.msrb.mxu1 %v221_v7 }
  0x20   :  { %142 = vmatpush.msra.mxu2 %v95_v34  ;;  %162 = vmatpush.msra.mxu3 %v111_v37 }
  0x21   :  { %199 = vmatpush.msrb.mxu0 %v176_v51  ;;  %237 = vmatpush.msrb.mxu1 %v220_v8 }
  0x22   :  { %143 = vmatpush.msra.mxu2 %v94_v36  ;;  %163 = vmatpush.msra.mxu3 %v110_v39 }
  0x23   :  { %200 = vmatpush.msrb.mxu0 %v175_v60  ;;  %238 = vmatpush.msrb.mxu1 %v219_v9 }
  0x24   :  { %144 = vmatpush.msra.mxu2 %v93_v38  ;;  %164 = vmatpush.msra.mxu3 %v109_v40 }
  0x25   :  { %201 = vmatpush.msrb.mxu0 %v174_v61  ;;  %239 = vmatpush.msrb.mxu1 %v218_v10 }
  0x27   :  { %202 = vmatpush.msrb.mxu0 %v173_v62  ;;  %240 = vmatpush.msrb.mxu1 %v217_v11 }
  0x29   :  { %203 = vmatpush.msrb.mxu0 %v172_v63  ;;  %241 = vmatpush.msrb.mxu1 %v216_v13 }
  0x2b   :  { %204 = vmatpush.msrb.mxu0 %v171_v0  ;;  %242 = vmatpush.msrb.mxu1 %v215_v19 }
  0x2d   :  { %205 = vmatpush.msrb.mxu0 %v170_v1  ;;  %243 = vmatpush.msrb.mxu1 %v214_v20 }
  0x2f   :  { %244 = vmatpush.msrb.mxu1 %v213_v21 }
  0x31   :  { %245 = vmatpush.msrb.mxu1 %v212_v22 }
  0x33   :  { %246 = vmatpush.msrb.mxu1 %v211_v23 }
  0x86   :  { %v68_v54 = vpop.f32.mrf.mxu0  ;;  %v88_v55 = vpop.f32.mrf.mxu1 }
  0x87   :  { %v69_v56 = vadd.f32 %v68_v54, %v43_v52  ;;  %v89_v57 = vadd.f32 %v88_v55, %v44_v53 }
  0x89   :  { %282 = vtanh.f32 %v69_v56 }
  0x8a   :  { %284 = vtanh.f32 %v89_v57 }
  0x8f   :  { %v283_v58 = vpop.eup %282 }
  0x90   :  { %v285_v59 = vpop.eup %284  ;;  %145 = vmatmul.f32.vlgmr.msra.gmra.mxu2 %v283_v58 }
  0x91   :  { %165 = vmatmul.f32.vlgmr.msra.gmra.mxu3 %v285_v59 }
 0x113   :  { %v146_v14 = vpop.f32.mrf.mxu2 }
 0x114   :  { %v147_v15 = vadd.f32 %v279_v12, %v146_v14  ;;  %v166_v16 = vpop.f32.mrf.mxu3 }
 0x116   :  { %v167_v17 = vadd.f32 %v166_v16, %v147_v15 }
 0x118   :  { %286 = vtanh.f32 %v167_v17 }
 0x11e   :  { %v287_v18 = vpop.eup %286 }
 0x11f   :  { %206 = vmatmul.f32.vlgmr.msrb.gmra.mxu0 %v287_v18 }
 0x19c   :  { %v207_v25 = vpop.f32.mrf.mxu0 }
 0x19d   :  { %v208_v26 = vadd.f32 %v280_v24, %v207_v25 }
 0x19f   :  { %288 = vtanh.f32 %v208_v26 }
 0x1a5   :  { %v289_v27 = vpop.eup %288 }
 0x1a6   :  { %247 = vmatmul.f32.vlgmr.msrb.gmra.mxu1 %v289_v27 }
 0x223   :  { %v248_v29 = vpop.f32.mrf.mxu1 }
 0x224   :  { %v249_v30 = vadd.f32 %v281_v28, %v248_v29 }
 0x226   :  { %v278_v31 = vmul.f32 -1.442695, %v249_v30 }
 0x228   :  { %290 = vpow2.f32 %v278_v31 }
 0x22e   :  { %v291_v32 = vpop.eup %290 }
 0x22f   :  { %v254_v33 = vadd.f32 1.0, %v291_v32 }
 0x231   :  { %292 = vrcp.f32 %v254_v33  ;;  %v266_v37 = vand.u32 2147483648, %v254_v33  ;;  %v264_v39 = vand.u32 2147483647, %v254_v33  ;;  %vm260_vm2 = vweird.f32 %v254_v33 }
 0x233   :  { %v267_v41 = vor.u32 1.1754944e-38, %v266_v37  ;;  %vm265_vm5 = vcmp.eq.f32.partialorder %v264_v39, 8.507059e+37 }
 0x237   :  { %v293_v34 = vpop.eup %292 }
 0x238   :  { %v256_v35 = vmul.f32 %v293_v34, %v254_v33  ;;  %vm261_vm1 = vweird.f32 %v293_v34 }
 0x239   :  { %vm262_vm3 = vmor %vm260_vm2, %vm261_vm1 }
 0x23a   :  { %v257_v36 = vsub.f32 1.0, %v256_v35 }
 0x23c   :  { %v258_v38 = vmul.f32 %v293_v34, %v257_v36 }
 0x23e   :  { %v259_v40 = vadd.f32 %v293_v34, %v258_v38 }
 0x240   :  { %v263_v42 = vsel %vm262_vm3, %v293_v34, %v259_v40 }
 0x241   :  { %v268_v43 = vsel %vm265_vm5, %v267_v41, %v263_v42 }
 0x242   :  { %271 = vst.msk [vmem:[%s587_s9] sm:$0xff] %vm270_vm4, %v268_v43 }

</bundles_post_ra>
